<compile_context>
chip_gen: v7x
topology: tpu7x:2x2x1
jax: 0.10.0
libtpu: 0.0.40
codegen_flags: <defaults>
</compile_context>

<pallas_src>
import jax
import jax.numpy as jnp
import numpy as np
from jax.experimental import pallas as pl
from jax.experimental.pallas import tpu as pltpu


def attention_kernel(x_ref, vt_ref, w_ref, attn_ref, wts_ref):
    TB, N, H = x_ref.shape
    Vd = vt_ref.shape[1]

    x3 = x_ref[...]                                   # (TB, N, H)
    vt = vt_ref[...]                                  # (H, Vd)
    w_row = w_ref[...]                                # (1, Vd)

    # One MXU matmul for all TB bags at once, then tanh on the EUP.
    x2 = x3.reshape(TB * N, H).astype(vt.dtype)
    h = jnp.tanh(
        jnp.dot(x2, vt, preferred_element_type=jnp.float32)
    )                                                 # (TB*N, Vd) f32
    h3 = h.reshape(TB, N, Vd)

    # Score s = w @ tanh(Vx): VPU multiply + XLU lane reduce (no K=Vd, N=1 MXU op).
    s = jnp.sum(h3 * w_row.astype(jnp.float32), axis=-1)      # (TB, N)

    # Softmax over the N scores. Max-subtraction is mathematically identical to
    # exp(s)/sum(exp(s)) and avoids overflow for large scores.
    m = jnp.max(s, axis=-1, keepdims=True)            # (TB, 1)
    u = jnp.exp(s - m)                                # (TB, N)
    denom = jnp.sum(u, axis=-1, keepdims=True)        # (TB, 1)
    inv = pl.reciprocal(denom, approx=True)           # EUP slot (otherwise idle)
    inv = inv * (2.0 - denom * inv)                   # one Newton step -> f32 accuracy
    w_norm = u * inv                                  # (TB, N)

    # Weighted pooling: VPU multiply + sublane reduce over N for the whole block.
    attn = jnp.sum(w_norm[:, :, None] * x3.astype(jnp.float32), axis=1)   # (TB, H)

    attn_ref[...] = attn.astype(attn_ref.dtype)       # (TB, H)   sublane-dense
    wts_ref[...] = w_norm.astype(wts_ref.dtype)       # (TB, N)   no trailing singleton


def attention_forward(x, V_weight, w_weight, *, block_b=None, use_bf16_matmul=False):
    """x: (B, N, H) f32; V_weight: (Vd, H); w_weight: (1, Vd).
    Returns (attn_embeddings (B, H), weights (B, N)), both float32."""
    B, N, H = x.shape
    Vd = V_weight.shape[0]

    if block_b is None:
        # Keep the double-buffered x block (2 * TB * N * H * 4 B) under ~8 MiB so it
        # fits comfortably on v5e/v6e/v7x, and cap at 512 so large B still gives a
        # multi-step grid (sharded across v7x's two TensorCores).
        vmem_cap = max(8, ((8 * 1024 * 1024) // (2 * N * H * 4)) // 8 * 8)
        block_b = min(B, 512, vmem_cap)
    TB = block_b

    # Pad batch to a multiple of TB (padded bags are finite and sliced off below).
    B_pad = pl.cdiv(B, TB) * TB
    x_in = jnp.pad(x, ((0, B_pad - B), (0, 0), (0, 0))) if B_pad != B else x

    vt = V_weight.T            # (H, Vd)  pre-transposed -> no in-VMEM transpose
    w_row = w_weight           # (1, Vd)

    # TODO(synk): on v6e/v7x, flipping use_bf16_matmul=True (bf16 MXU inputs, f32
    # accumulation/softmax) ~doubles MXU throughput and halves x traffic, but departs
    # from torch f32 numerics; kept off by default (and should stay off on v5e).
    if use_bf16_matmul:
        x_in = x_in.astype(jnp.bfloat16)
        vt = vt.astype(jnp.bfloat16)
        w_row = w_row.astype(jnp.bfloat16)

    cost = pl.CostEstimate(
        flops=2 * B_pad * N * H * Vd + 2 * B_pad * N * Vd + 2 * B_pad * N * H,
        transcendentals=B_pad * N * (Vd + 1),           # tanh per (n, Vd) + exp per n
        bytes_accessed=int(x_in.size) * x_in.dtype.itemsize
        + (H * Vd + Vd) * 4
        + B_pad * (H + N) * 4,
    )

    attn, wts = pl.pallas_call(
        attention_kernel,
        out_shape=(
            jax.ShapeDtypeStruct((B_pad, H), jnp.float32),
            jax.ShapeDtypeStruct((B_pad, N), jnp.float32),
        ),
        grid_spec=pltpu.PrefetchScalarGridSpec(
            num_scalar_prefetch=0,
            grid=(B_pad // TB,),
            in_specs=[
                pl.BlockSpec((TB, N, H), lambda b: (b, 0, 0)),   # TB bags of X
                pl.BlockSpec((H, Vd), lambda b: (0, 0)),         # V^T (shared)
                pl.BlockSpec((1, Vd), lambda b: (0, 0)),         # w row (shared)
            ],
            out_specs=(
                pl.BlockSpec((TB, H), lambda b: (b, 0)),         # attn, sublane-dense
                pl.BlockSpec((TB, N), lambda b: (b, 0)),         # weights, lane-dense
            ),
        ),
        compiler_params=pltpu.CompilerParams(
            dimension_semantics=("parallel",),
            vmem_limit_bytes=32 * 1024 * 1024,
        ),
        cost_estimate=cost,
    )(x_in, vt, w_row)

    return attn[:B], wts[:B]


def attention_reference(x, V_weight, w_weight):
    # float64 numpy reference (authoritative, avoids XLA matmul-precision quirks).
    x64 = np.asarray(x, dtype=np.float64)
    V64 = np.asarray(V_weight, dtype=np.float64)
    w64 = np.asarray(w_weight, dtype=np.float64)
    h = np.tanh(np.einsum('bnh,vh->bnv', x64, V64))
    s = np.einsum('bnv,ov->bno', h, w64)[..., 0]                # (B, N)
    u = np.exp(s)
    wts = u / np.sum(u, axis=1, keepdims=True)                  # (B, N)
    attn = np.einsum('bn,bnh->bh', wts, x64)                    # (B, H)
    return attn, wts


if __name__ == "__main__":
    B, N, hidden_dim, v_dim = 2, 8, 32, 16

    key = jax.random.PRNGKey(0)
    kx, kv, kw = jax.random.split(key, 3)

    x = jax.random.normal(kx, (B, N, hidden_dim), dtype=jnp.float32)

    # Deterministic Xavier-normal init (matches torch.nn.init.xavier_normal_ std).
    std_V = float(np.sqrt(2.0 / (hidden_dim + v_dim)))
    std_w = float(np.sqrt(2.0 / (v_dim + 1)))
    V_weight = std_V * jax.random.normal(kv, (v_dim, hidden_dim), dtype=jnp.float32)
    w_weight = std_w * jax.random.normal(kw, (1, v_dim), dtype=jnp.float32)

    attn, wts = attention_forward(x, V_weight, w_weight)
    attn = jax.block_until_ready(attn)
    wts = jax.block_until_ready(wts)

    attn_ref, wts_ref = attention_reference(x, V_weight, w_weight)
    assert attn.shape == (B, hidden_dim) and wts.shape == (B, N)
    np.testing.assert_allclose(np.asarray(attn), attn_ref, rtol=1e-4, atol=1e-4)
    np.testing.assert_allclose(np.asarray(wts), wts_ref, rtol=1e-4, atol=1e-4)

    print("KERNEL_OK")
</pallas_src>

<mosaic_0001>
module attributes {stable_mosaic.version = 11 : i64} {
  func.func @attention_kernel(%arg0: i32, %arg1: memref<2x8x32xf32, #tpu.memory_space<vmem>>, %arg2: memref<32x16xf32, #tpu.memory_space<vmem>>, %arg3: memref<1x16xf32, #tpu.memory_space<vmem>>, %arg4: memref<2x32xf32, #tpu.memory_space<vmem>>, %arg5: memref<2x8xf32, #tpu.memory_space<vmem>>) attributes {dimension_semantics = [#tpu.dimension_semantics<parallel>], iteration_bounds = array<i64: 1>, scalar_prefetch = 0 : i64, scratch_operands = 0 : i64, tpu.core_type = #tpu.core_type<tc>, window_params = [{transform_indices = @transform_0, window_bounds = array<i64: 2, 8, 32>}, {pipeline_mode = #tpu.pipeline_mode<synchronous>, transform_indices = @transform_1, window_bounds = array<i64: 32, 16>}, {pipeline_mode = #tpu.pipeline_mode<synchronous>, transform_indices = @transform_2, window_bounds = array<i64: 1, 16>}, {transform_indices = @transform_3, window_bounds = array<i64: 2, 32>}, {transform_indices = @transform_4, window_bounds = array<i64: 2, 8>}]} {
    %c0 = arith.constant 0 : index
    %c0_0 = arith.constant 0 : index
    %c0_1 = arith.constant 0 : index
    %0 = vector.load %arg1[%c0, %c0_0, %c0_1] : memref<2x8x32xf32, #tpu.memory_space<vmem>>, vector<2x8x32xf32>
    %c0_2 = arith.constant 0 : index
    %c0_3 = arith.constant 0 : index
    %1 = vector.load %arg2[%c0_2, %c0_3] : memref<32x16xf32, #tpu.memory_space<vmem>>, vector<32x16xf32>
    %c0_4 = arith.constant 0 : index
    %c0_5 = arith.constant 0 : index
    %2 = vector.load %arg3[%c0_4, %c0_5] : memref<1x16xf32, #tpu.memory_space<vmem>>, vector<1x16xf32>
    %3 = vector.shape_cast %0 : vector<2x8x32xf32> to vector<16x32xf32>
    %cst = arith.constant dense<0.000000e+00> : vector<16x16xf32>
    %4 = tpu.matmul %3, %1, %cst {dimension_numbers = #tpu.dot_dimension_numbers<[1], [0], [0], [1], [0, 0, 1, 1], [], []>} : vector<16x32xf32>, vector<32x16xf32>, vector<16x16xf32> -> vector<16x16xf32>
    %5 = math.tanh %4 : vector<16x16xf32>
    %6 = vector.shape_cast %5 : vector<16x16xf32> to vector<2x8x16xf32>
    %7 = vector.shape_cast %2 : vector<1x16xf32> to vector<1x1x16xf32>
    %8 = vector.broadcast %7 : vector<1x1x16xf32> to vector<2x8x16xf32>
    %9 = arith.mulf %6, %8 : vector<2x8x16xf32>
    %cst_6 = arith.constant dense<0.000000e+00> : vector<2x8xf32>
    %10 = vector.multi_reduction <add>, %9, %cst_6 [2] : vector<2x8x16xf32> to vector<2x8xf32>
    %cst_7 = arith.constant dense<0xFF800000> : vector<2xf32>
    %11 = vector.multi_reduction <maximumf>, %10, %cst_7 [1] : vector<2x8xf32> to vector<2xf32>
    %12 = vector.shape_cast %11 : vector<2xf32> to vector<2x1xf32>
    %13 = vector.broadcast %12 : vector<2x1xf32> to vector<2x8xf32>
    %14 = arith.subf %10, %13 : vector<2x8xf32>
    %15 = math.exp %14 : vector<2x8xf32>
    %cst_8 = arith.constant dense<0.000000e+00> : vector<2xf32>
    %16 = vector.multi_reduction <add>, %15, %cst_8 [1] : vector<2x8xf32> to vector<2xf32>
    %17 = vector.shape_cast %16 : vector<2xf32> to vector<2x1xf32>
    %18 = tpu.reciprocal %17 {approx = true} : vector<2x1xf32> -> vector<2x1xf32>
    %19 = arith.mulf %17, %18 : vector<2x1xf32>
    %cst_9 = arith.constant 2.000000e+00 : f32
    %20 = vector.broadcast %cst_9 : f32 to vector<2x1xf32>
    %21 = arith.subf %20, %19 : vector<2x1xf32>
    %22 = arith.mulf %18, %21 : vector<2x1xf32>
    %23 = vector.broadcast %22 : vector<2x1xf32> to vector<2x8xf32>
    %24 = arith.mulf %15, %23 : vector<2x8xf32>
    %25 = vector.shape_cast %24 : vector<2x8xf32> to vector<2x8x1xf32>
    %26 = vector.broadcast %25 : vector<2x8x1xf32> to vector<2x8x32xf32>
    %27 = arith.mulf %26, %0 : vector<2x8x32xf32>
    %cst_10 = arith.constant dense<0.000000e+00> : vector<2x32xf32>
    %28 = vector.multi_reduction <add>, %27, %cst_10 [1] : vector<2x8x32xf32> to vector<2x32xf32>
    %c0_11 = arith.constant 0 : index
    %c0_12 = arith.constant 0 : index
    %29 = vector.load %arg4[%c0_11, %c0_12] : memref<2x32xf32, #tpu.memory_space<vmem>>, vector<2x32xf32>
    tpu.vector_store %arg4[%c0_11, %c0_12], %28 {strides = array<i32>} : memref<2x32xf32, #tpu.memory_space<vmem>>, vector<2x32xf32>,
    %c0_13 = arith.constant 0 : index
    %c0_14 = arith.constant 0 : index
    %30 = vector.load %arg5[%c0_13, %c0_14] : memref<2x8xf32, #tpu.memory_space<vmem>>, vector<2x8xf32>
    tpu.vector_store %arg5[%c0_13, %c0_14], %24 {strides = array<i32>} : memref<2x8xf32, #tpu.memory_space<vmem>>, vector<2x8xf32>,
    return
  }
  func.func @transform_0(%arg0: i32) -> (i32, i32, i32) {
    %c0_i32 = arith.constant 0 : i32
    %c0_i32_0 = arith.constant 0 : i32
    %c0_i32_1 = arith.constant 0 : i32
    return %arg0, %c0_i32, %c0_i32_0 : i32, i32, i32
  }
  func.func @transform_1(%arg0: i32) -> (i32, i32) {
    %c0_i32 = arith.constant 0 : i32
    %c0_i32_0 = arith.constant 0 : i32
    %c0_i32_1 = arith.constant 0 : i32
    return %c0_i32, %c0_i32_0 : i32, i32
  }
  func.func @transform_2(%arg0: i32) -> (i32, i32) {
    %c0_i32 = arith.constant 0 : i32
    %c0_i32_0 = arith.constant 0 : i32
    %c0_i32_1 = arith.constant 0 : i32
    return %c0_i32, %c0_i32_0 : i32, i32
  }
  func.func @transform_3(%arg0: i32) -> (i32, i32) {
    %c0_i32 = arith.constant 0 : i32
    %c0_i32_0 = arith.constant 0 : i32
    return %arg0, %c0_i32 : i32, i32
  }
  func.func @transform_4(%arg0: i32) -> (i32, i32) {
    %c0_i32 = arith.constant 0 : i32
    %c0_i32_0 = arith.constant 0 : i32
    return %arg0, %c0_i32 : i32, i32
  }
}

</mosaic_0001>

<bundles_post_ra>
// kernel: tpu_custom_call.1
= control target key start
LH: loop header
LB: loop body
LE: loop exit
PB: predicated region body
PF: predicated region fallthrough
CT: control target
= control target key end

     0   :  { %10 = vsyncpa [#allocation3], 0  ;;  %vm25_vm0 = vcmask 261120   ;;  %s452_s0 = inlined_call_operand.vmem [shape: f32[2,8,32], index: 0, kind: input, shape index: {}]   ;;  %s453_s1 = inlined_call_operand.vmem [shape: f32[32,16], index: 1, kind: input, shape index: {}]   ;;  %s454_s2 = inlined_call_operand.vmem [shape: f32[1,16], index: 2, kind: input, shape index: {}]   ;;  %s455_s3 = inlined_call_operand.hbm [shape: f32[2,32], index: 3, kind: output, shape index: {0}]   ;;  %s456_s4 = inlined_call_operand.hbm [shape: f32[2,8], index: 4, kind: output, shape index: {1}]  }
   0x1   :  { %v20_v0 = vld [vmem:[%s453_s1] sm:$0xff]  ;;  %v21_v1 = vld [vmem:[%s453_s1 + $0x8] sm:$0xff]  ;;  %v22_v2 = vld [vmem:[%s453_s1 + $0x10] sm:$0xff] }
   0x2   :  { %v289_v3 = vpack.c.bf16 %v21_v1, %v20_v0  ;;  %v23_v4 = vld [vmem:[%s453_s1 + $0x18] sm:$0xff]  ;;  %v403_v5 = vld [vmem:[%s452_s0] sm:$0xff] }
   0x3   :  { %v293_v6 = vpack.c.bf16 %v23_v4, %v22_v2  ;;  %286 = vmatprep.mubr.msk.f32.mxu0 %vm25_vm0, %v403_v5 }
   0x4   :  { %11 = vsyncpa [#allocation5], 0  ;;  %290 = vmatprep.subr.bf16.mxu0 %v289_v3  ;;  %v410_v7 = vld [vmem:[%s452_s0 + $0x8] sm:$0xff]  ;;  %v271_v10 = vld [vmem:[%s454_s2] ss:$0 sm:$0xff]  ;;  %vm117_vm1 = vcmask 130048   ;;  %v126_v17 = vlaneseq }
   0x5   :  { %292 = vmatpush3.bf16.msra.mxu0 %v289_v3  ;;  %vm136_vm2 = vcmask 1041409   ;;  %vm139_vm3 = vcmask 58368   ;;  %v360_v27 = vmov 0   ;;  %s361_s0 = smov [#allocation4]  }
   0x6   :  { %294 = vmatprep.subr.bf16.mxu0 %v293_v6  ;;  %v127_v18 = vand.u32 127, %v126_v17  ;;  %v129_v19 = vshrl.u32 %v126_v17, 7  ;;  %301 = vset.pattern.permute.xlu0 %v360_v27  ;;  %s257_s2 = sshll.u32 %s361_s0, 4  ;;  %s258_s2 = int_to_ptr.vmem [resolvable:$true] %s257_s2 }
   0x7   :  { %300 = vset.pattern.permute.xlu1 %v360_v27  ;;  %s312_s28 = scalar_lea.vmem %s258_s2, 32  ;;  %p317_p1 = scmp.lt.s32.totalorder %s258_s2, %s258_s2 }
   0x8   :  { %v130_v21 = vsub.s32 %v127_v18, %v129_v19  ;;  %v146_v28 = vsub.s32 0, %v129_v19  ;;  %v150_v29 = vsub.s32 1, %v129_v19  ;;  %p313_p0 = scmp.ne.s32.totalorder %s258_s2, %s312_s28  ;;  %p318_p2 = scmp.lt.s32.totalorder %s312_s28, %s312_s28 }
   0x9   :  { %296 = vmatpush3.bf16.msra.mxu0 %v293_v6 }
   0xa   :  { %p319_p3 = por %p318_p2, %p317_p1 }
   0xc   :  { %287 = vmatmul.mubr.msk.f32.vlgmr.msra.gmra.mrb[0].mxu0 %vm25_vm0, %v410_v7  ;;  %p320_p4 = pnand %p319_p3, %p313_p0 }
  0xdf   :  { %v288_v8 = vpop.f32.mrb[0].mxu0 }
  0xe0   :  { %302 = vtanh.f32 %v288_v8  ;;  %v98_v9 = vpop.f32.mrb[1].mxu0 }
  0xe1   :  { %304 = vtanh.f32 %v98_v9 }
  0xea   :  { %v303_v11 = vpop.eup %302 }
  0xeb   :  { %v305_v12 = vpop.eup %304  ;;  %v116_v15 = vmul.f32 %v303_v11, %v271_v10 }
  0xec   :  { %v115_v13 = vmul.f32 %v305_v12, %v271_v10 }
  0xed   :  { %v121_v16 = vsel %vm117_vm1, %v116_v15, 0.0 }
  0xee   :  { %v118_v14 = vsel %vm117_vm1, %v115_v13, 0.0 }
  0xef   :  { %119 = vadd.xlane.f32.xlu0 %v118_v14 }
  0xf3   :  { %122 = vadd.xlane.f32.xlu0 %v121_v16 }
 0x17c   :  { %v120_v20 = vpop.xlane.xlu0 %119 }
 0x17d   :  { %v131_v23 = vrot.slane %v120_v20, %v130_v21 }
 0x180   :  { %v123_v22 = vpop.xlane.xlu0 %122 }
 0x181   :  { %v135_v24 = vrot.slane %v123_v22, %v130_v21 }
 0x183   :  { %v137_v25 = vsel %vm136_vm2, %v135_v24, %v131_v23 }
 0x184   :  { %v140_v26 = vsel %vm139_vm3, %v137_v25, -inf }
 0x185   :  { %141 = vmax.xlane.f32.xlu1 %v140_v26 }
 0x212   :  { %v142_v30 = vpop.xlane.xlu1 %141 }
 0x213   :  { %v147_v31 = vrot.slane %v142_v30, %v146_v28  ;;  %v151_v32 = vrot.slane %v142_v30, %v150_v29 }
 0x215   :  { %v154_v33 = vsub.f32 %v120_v20, %v147_v31  ;;  %v155_v34 = vsub.f32 %v123_v22, %v151_v32 }
 0x217   :  { %v156_v35 = vmul.f32 1.442695, %v154_v33  ;;  %v158_v36 = vmul.f32 1.442695, %v155_v34 }
 0x219   :  { %306 = vpow2.f32 %v156_v35 }
 0x21a   :  { %308 = vpow2.f32 %v158_v36 }
 0x223   :  { %v307_v37 = vpop.eup %306 }
 0x224   :  { %v309_v38 = vpop.eup %308  ;;  %163 = vperm.xlu1 %300, %v307_v37  }
 0x225   :  { %166 = vperm.xlu0 %301, %v309_v38  }
 0x2a3   :  { %v164_v39 = vpop.permute.xlu1 %163 }
 0x2a4   :  { %v167_v40 = vpop.permute.xlu0 %166  ;;  %v171_v41 = vrot.slane %v164_v39, %v130_v21 }
 0x2a5   :  { %v175_v42 = vrot.slane %v167_v40, %v130_v21 }
 0x2a7   :  { %v176_v43 = vsel %vm136_vm2, %v175_v42, %v171_v41 }
 0x2a8   :  { %v178_v44 = vsel %vm139_vm3, %v176_v43, 0.0 }
 0x2a9   :  { %179 = vadd.xlane.f32.xlu1 %v178_v44 }
 0x336   :  { %v180_v45 = vpop.xlane.xlu1 %179 }
 0x337   :  { %310 = vrcp.f32 %v180_v45 }
 0x341   :  { %v311_v46 = vpop.eup %310 }
 0x342   :  { %v182_v47 = vmul.f32 %v311_v46, %v180_v45 }
 0x344   :  { %v183_v48 = vsub.f32 2.0, %v182_v47 }
 0x346   :  { %v184_v49 = vmul.f32 %v311_v46, %v183_v48 }
 0x348   :  { %v189_v50 = vrot.slane %v184_v49, %v146_v28  ;;  %v193_v51 = vrot.slane %v184_v49, %v150_v29 }
 0x34a   :  { %v196_v52 = vmul.f32 %v307_v37, %v189_v50  ;;  %v197_v53 = vmul.f32 %v309_v38, %v193_v51 }
 0x34c   :  { %200 = vperm.xlu0 %301, %v196_v52  }
 0x350   :  { %205 = vperm.xlu0 %301, %v197_v53  }
 0x3cb   :  { %v201_v54 = vpop.permute.xlu0 %200 }
 0x3cc   :  { %v208_v55 = vmul.f32 %v201_v54, %v403_v5  ;;  %v233_v59 = vrot.slane %v201_v54, %v130_v21 }
 0x3ce   :  { %v210_v56 = vsel %vm25_vm0, %v208_v55, 0.0 }
 0x3cf   :  { %v211_v57 = vrot.slane %v210_v56, 4  ;;  %v206_v58 = vpop.permute.xlu0 %205 }
 0x3d0   :  { %v209_v60 = vmul.f32 %v206_v58, %v410_v7  ;;  %v237_v61 = vrot.slane %v206_v58, %v130_v21 }
 0x3d1   :  { %v212_v62 = vadd.f32 %v211_v57, %v210_v56 }
 0x3d2   :  { %v217_v63 = vsel %vm25_vm0, %v209_v60, 0.0  ;;  %v238_v0 = vsel %vm136_vm2, %v237_v61, %v233_v59 }
 0x3d3   :  { %v213_v1 = vrot.slane %v212_v62, 2  ;;  %v218_v2 = vrot.slane %v217_v63, 4  ;;  %240 = vst.msk [vmem:[#allocation4] sm:$0x3] %vm139_vm3, %v238_v0 }
 0x3d4   :  { %323 = shalt.err (!%p320_p4)
}
 0x3d5   :  { %s324_s5 = scalar_lea.hbm %s456_s4, 32 }
 0x3d6   :  { %p325_p5 = scmp.ne.s32.totalorder %s456_s4, %s324_s5  ;;  %p328_p6 = scmp.lt.u32.totalorder %s324_s5, %s456_s4 }
 0x3d8   :  { %p330_p7 = pnand %p328_p6, %p325_p5 }
 0x3da   :  { %333 = shalt.err (!%p330_p7)
}
 0x3db   :  { %260 = dma.vmem_to_hbm [thread:$0]  %s258_s2, 32, %s456_s4, [#allocation5]   ;;  %v214_v3 = vadd.f32 %v213_v1, %v212_v62  ;;  %v219_v4 = vadd.f32 %v218_v2, %v217_v63  ;;  %vm228_vm4 = vcmask 254976  }
 0x3dc   :  { %s362_s12 = smov [#allocation2]  }
 0x3dd   :  { %v220_v5 = vrot.slane %v219_v4, 2  ;;  %v215_v7 = vrot.slane %v214_v3, 1  ;;  %s247_s13 = sshll.u32 %s362_s12, 4  ;;  %s248_s13 = int_to_ptr.vmem [resolvable:$true] %s247_s13 }
 0x3de   :  { %s334_s14 = scalar_lea.vmem %s248_s13, 32  ;;  %p339_p9 = scmp.lt.s32.totalorder %s248_s13, %s248_s13 }
 0x3df   :  { %v221_v6 = vadd.f32 %v220_v5, %v219_v4  ;;  %v216_v9 = vadd.f32 %v215_v7, %v214_v3  ;;  %p335_p8 = scmp.ne.s32.totalorder %s248_s13, %s334_s14  ;;  %p340_p10 = scmp.lt.s32.totalorder %s334_s14, %s334_s14 }
 0x3e1   :  { %v222_v8 = vrot.slane %v221_v6, 1  ;;  %p341_p11 = por %p340_p10, %p339_p9 }
 0x3e3   :  { %v223_v10 = vadd.f32 %v222_v8, %v221_v6  ;;  %p342_p12 = pnand %p341_p11, %p335_p8 }
 0x3e5   :  { %v226_v11 = vsel %vm136_vm2, %v223_v10, %v216_v9 }
 0x3e6   :  { %229 = vst.msk [vmem:[#allocation2] sm:$0x3] %vm228_vm4, %v226_v11 }
 0x3e7   :  { %345 = shalt.err (!%p342_p12)
}
 0x3e8   :  { %s346_s16 = scalar_lea.hbm %s455_s3, 32 }
 0x3e9   :  { %p347_p13 = scmp.ne.s32.totalorder %s455_s3, %s346_s16  ;;  %p350_p0 = scmp.lt.u32.totalorder %s346_s16, %s455_s3 }
 0x3eb   :  { %p352_p1 = pnand %p350_p0, %p347_p13 }
 0x3ed   :  { %355 = shalt.err (!%p352_p1)
}
 0x3ee   :  { %250 = dma.vmem_to_hbm [thread:$0]  %s248_s13, 32, %s455_s3, [#allocation3]  }
 0x3ef   :  { %356 = dma.done.wait [#allocation3], 32  }
 0x3f0   :  { %357 = vsyncadd [#allocation3], 4294967264 }
 0x3f1   :  { %358 = dma.done.wait [#allocation5], 32  }
 0x3f2   :  { %359 = vsyncadd [#allocation5], 4294967264 }
 0x3f3   :  { %267 = vsyncpa [#allocation3], 1 }
 0x3f4   :  { %268 = vsyncpa [#allocation5], 1 }

</bundles_post_ra>
